<compile_context>
chip_gen: v7x
topology: tpu7x:2x2x1
jax: 0.10.0
libtpu: 0.0.40
codegen_flags: <defaults>
</compile_context>

<pallas_src>
import functools

import jax
import jax.numpy as jnp
from jax.experimental import pallas as pl
from jax.experimental.pallas import tpu as pltpu

_LANE = 128
_DEFAULT_TILE_B = 32768                 # batch rows per grid step (lane axis)
_VMEM_LIMIT_BYTES = 48 * 1024 * 1024    # fits v7x (64 MiB) and v5e/v6e (128 MiB)


def mushroom_net_kernel(x_ref, w1_ref, b1_ref, w2_ref, b2_ref, w3_ref, b3_ref,
                        o_ref):
    x = x_ref[...]                                            # (in, T) bf16
    # layer1 + ReLU: bf16 x bf16 on the MXU, f32 accumulate, f32 epilogue.
    h1 = jnp.dot(w1_ref[...], x, preferred_element_type=jnp.float32)
    h1 = jnp.maximum(h1 + b1_ref[...], 0.0)                   # (16, T) f32
    # layer2 + ReLU: f32 activations straight into the MXU (no cast pass).
    h2 = jnp.dot(w2_ref[...], h1, preferred_element_type=jnp.float32)
    h2 = jnp.maximum(h2 + b2_ref[...], 0.0)                   # (8, T) f32
    # output layer (no activation); store bf16 to halve the output HBM write.
    out = jnp.dot(w3_ref[...], h2, preferred_element_type=jnp.float32)
    o_ref[...] = (out + b3_ref[...]).astype(o_ref.dtype)      # (2, T) bf16


@functools.partial(jax.jit, static_argnames=("tile_b",))
def _forward_impl(x, w1, b1, w2, b2, w3, b3, *, tile_b):
    batch, input_dim = x.shape
    out_dim = w3.shape[0]

    padded_b = -(-batch // tile_b) * tile_b
    grid = (padded_b // tile_b,)

    # Batch rides the lane axis: cast + transpose + pad fuse into one XLA pass
    # under this jit.  For a real hot path, accept x feature-major bf16
    # upstream and drop this entirely.
    x_t = jnp.pad(x.astype(jnp.bfloat16).T, ((0, 0), (0, padded_b - batch)))
    w1 = w1.astype(jnp.bfloat16)   # matches x on the MXU; w2/w3 stay f32

    def resident(arr):
        # Full-array block with a constant index map: DMA'd once, VMEM-resident.
        return pl.BlockSpec(arr.shape, lambda i: (0, 0))

    out_t = pl.pallas_call(
        mushroom_net_kernel,
        out_shape=jax.ShapeDtypeStruct((out_dim, padded_b), jnp.bfloat16),
        grid=grid,
        in_specs=[
            pl.BlockSpec((input_dim, tile_b), lambda i: (0, i)),  # x tile
            resident(w1), resident(b1),
            resident(w2), resident(b2),
            resident(w3), resident(b3),
        ],
        out_specs=pl.BlockSpec((out_dim, tile_b), lambda i: (0, i)),
        compiler_params=pltpu.CompilerParams(
            dimension_semantics=("parallel",),
            vmem_limit_bytes=_VMEM_LIMIT_BYTES,
        ),
    )(x_t, w1, b1, w2, b2, w3, b3)

    # Drop the batch padding, back to (batch, 2) row-major, f32 for callers.
    return out_t[:, :batch].T.astype(jnp.float32)


def mushroom_net_forward(x, params, *, tile_b=_DEFAULT_TILE_B):
    """Fused MLP forward pass.

    x: (batch, input_dim) float32
    params: dict in PyTorch layout:
        w1 (16, input_dim), b1 (16, 1), w2 (8, 16), b2 (8, 1),
        w3 (2, 8),          b3 (2, 1)
    Returns (batch, 2) float32.
    """
    batch = x.shape[0]
    padded_lanes = -(-batch // _LANE) * _LANE
    tb = min(tile_b, padded_lanes)       # both are multiples of 128
    return _forward_impl(x, params["w1"], params["b1"], params["w2"],
                         params["b2"], params["w3"], params["b3"], tile_b=tb)


def init_params(key, input_dim):
    """Deterministic synthetic params in PyTorch (out, in) layout."""
    k1, k2, k3, k4, k5, k6 = jax.random.split(key, 6)
    w1 = jax.random.normal(k1, (16, input_dim), jnp.float32) * 0.1
    b1 = jax.random.normal(k2, (16, 1), jnp.float32) * 0.1
    w2 = jax.random.normal(k3, (8, 16), jnp.float32) * 0.1
    b2 = jax.random.normal(k4, (8, 1), jnp.float32) * 0.1
    w3 = jax.random.normal(k5, (2, 8), jnp.float32) * 0.1
    b3 = jax.random.normal(k6, (2, 1), jnp.float32) * 0.1
    return {"w1": w1, "b1": b1, "w2": w2, "b2": b2, "w3": w3, "b3": b3}


def reference_forward(x, p):
    """Plain-JAX f32 reference (mirrors the PyTorch forward exactly)."""
    h1 = jnp.maximum(x @ p["w1"].T + p["b1"].T, 0.0)
    h2 = jnp.maximum(h1 @ p["w2"].T + p["b2"].T, 0.0)
    return h2 @ p["w3"].T + p["b3"].T


if __name__ == "__main__":
    # input_dim = len(label_encoders) in the original app; the mushroom
    # dataset has 22 categorical features.
    input_dim = 22
    batch = 8

    key = jax.random.PRNGKey(0)
    kx, kp = jax.random.split(key)
    x = jax.random.normal(kx, (batch, input_dim), jnp.float32)
    params = init_params(kp, input_dim)

    out = jax.block_until_ready(mushroom_net_forward(x, params))
    ref = reference_forward(x, params)

    assert out.shape == (batch, 2), out.shape
    # bf16 layer-1 inputs/weights + bf16 output store -> loose tolerance vs
    # the pure-f32 reference (layers 2/3 now stay in f32).
    assert jnp.allclose(out, ref, atol=2e-2, rtol=2e-2), "mismatch vs reference"

    print("KERNEL_OK")
</pallas_src>

<mosaic_0001>
module attributes {stable_mosaic.version = 11 : i64} {
  func.func @mushroom_net_kernel(%arg0: i32, %arg1: memref<22x128xbf16, #tpu.memory_space<vmem>>, %arg2: memref<16x22xbf16, #tpu.memory_space<vmem>>, %arg3: memref<16x1xf32, #tpu.memory_space<vmem>>, %arg4: memref<8x16xf32, #tpu.memory_space<vmem>>, %arg5: memref<8x1xf32, #tpu.memory_space<vmem>>, %arg6: memref<2x8xf32, #tpu.memory_space<vmem>>, %arg7: memref<2x1xf32, #tpu.memory_space<vmem>>, %arg8: memref<2x128xbf16, #tpu.memory_space<vmem>>) attributes {dimension_semantics = [#tpu.dimension_semantics<parallel>], iteration_bounds = array<i64: 1>, scalar_prefetch = 0 : i64, scratch_operands = 0 : i64, tpu.core_type = #tpu.core_type<tc>, window_params = [{transform_indices = @transform_0, window_bounds = array<i64: 22, 128>}, {pipeline_mode = #tpu.pipeline_mode<synchronous>, transform_indices = @transform_1, window_bounds = array<i64: 16, 22>}, {pipeline_mode = #tpu.pipeline_mode<synchronous>, transform_indices = @transform_2, window_bounds = array<i64: 16, 1>}, {pipeline_mode = #tpu.pipeline_mode<synchronous>, transform_indices = @transform_3, window_bounds = array<i64: 8, 16>}, {pipeline_mode = #tpu.pipeline_mode<synchronous>, transform_indices = @transform_4, window_bounds = array<i64: 8, 1>}, {pipeline_mode = #tpu.pipeline_mode<synchronous>, transform_indices = @transform_5, window_bounds = array<i64: 2, 8>}, {pipeline_mode = #tpu.pipeline_mode<synchronous>, transform_indices = @transform_6, window_bounds = array<i64: 2, 1>}, {transform_indices = @transform_7, window_bounds = array<i64: 2, 128>}]} {
    %c0 = arith.constant 0 : index
    %c0_0 = arith.constant 0 : index
    %0 = vector.load %arg1[%c0, %c0_0] : memref<22x128xbf16, #tpu.memory_space<vmem>>, vector<22x128xbf16>
    %c0_1 = arith.constant 0 : index
    %c0_2 = arith.constant 0 : index
    %1 = vector.load %arg2[%c0_1, %c0_2] : memref<16x22xbf16, #tpu.memory_space<vmem>>, vector<16x22xbf16>
    %cst = arith.constant dense<0.000000e+00> : vector<16x128xf32>
    %2 = tpu.matmul %1, %0, %cst {dimension_numbers = #tpu.dot_dimension_numbers<[1], [0], [0], [1], [0, 0, 1, 1], [], []>} : vector<16x22xbf16>, vector<22x128xbf16>, vector<16x128xf32> -> vector<16x128xf32>
    %c0_3 = arith.constant 0 : index
    %c0_4 = arith.constant 0 : index
    %3 = vector.load %arg3[%c0_3, %c0_4] : memref<16x1xf32, #tpu.memory_space<vmem>>, vector<16x1xf32>
    %4 = vector.broadcast %3 : vector<16x1xf32> to vector<16x128xf32>
    %5 = arith.addf %2, %4 : vector<16x128xf32>
    %cst_5 = arith.constant 0.000000e+00 : f32
    %6 = vector.broadcast %cst_5 : f32 to vector<16x128xf32>
    %7 = arith.maximumf %5, %6 : vector<16x128xf32>
    %c0_6 = arith.constant 0 : index
    %c0_7 = arith.constant 0 : index
    %8 = vector.load %arg4[%c0_6, %c0_7] : memref<8x16xf32, #tpu.memory_space<vmem>>, vector<8x16xf32>
    %cst_8 = arith.constant dense<0.000000e+00> : vector<8x128xf32>
    %9 = tpu.matmul %8, %7, %cst_8 {dimension_numbers = #tpu.dot_dimension_numbers<[1], [0], [0], [1], [0, 0, 1, 1], [], []>} : vector<8x16xf32>, vector<16x128xf32>, vector<8x128xf32> -> vector<8x128xf32>
    %c0_9 = arith.constant 0 : index
    %c0_10 = arith.constant 0 : index
    %10 = vector.load %arg5[%c0_9, %c0_10] : memref<8x1xf32, #tpu.memory_space<vmem>>, vector<8x1xf32>
    %11 = vector.broadcast %10 : vector<8x1xf32> to vector<8x128xf32>
    %12 = arith.addf %9, %11 : vector<8x128xf32>
    %cst_11 = arith.constant 0.000000e+00 : f32
    %13 = vector.broadcast %cst_11 : f32 to vector<8x128xf32>
    %14 = arith.maximumf %12, %13 : vector<8x128xf32>
    %c0_12 = arith.constant 0 : index
    %c0_13 = arith.constant 0 : index
    %15 = vector.load %arg6[%c0_12, %c0_13] : memref<2x8xf32, #tpu.memory_space<vmem>>, vector<2x8xf32>
    %cst_14 = arith.constant dense<0.000000e+00> : vector<2x128xf32>
    %16 = tpu.matmul %15, %14, %cst_14 {dimension_numbers = #tpu.dot_dimension_numbers<[1], [0], [0], [1], [0, 0, 1, 1], [], []>} : vector<2x8xf32>, vector<8x128xf32>, vector<2x128xf32> -> vector<2x128xf32>
    %c0_15 = arith.constant 0 : index
    %c0_16 = arith.constant 0 : index
    %17 = vector.load %arg7[%c0_15, %c0_16] : memref<2x1xf32, #tpu.memory_space<vmem>>, vector<2x1xf32>
    %18 = vector.broadcast %17 : vector<2x1xf32> to vector<2x128xf32>
    %19 = arith.addf %16, %18 : vector<2x128xf32>
    %20 = arith.truncf %19 : vector<2x128xf32> to vector<2x128xbf16>
    %c0_17 = arith.constant 0 : index
    %c0_18 = arith.constant 0 : index
    %21 = vector.load %arg8[%c0_17, %c0_18] : memref<2x128xbf16, #tpu.memory_space<vmem>>, vector<2x128xbf16>
    tpu.vector_store %arg8[%c0_17, %c0_18], %20 {strides = array<i32>} : memref<2x128xbf16, #tpu.memory_space<vmem>>, vector<2x128xbf16>,
    return
  }
  func.func @transform_0(%arg0: i32) -> (i32, i32) {
    %c0_i32 = arith.constant 0 : i32
    %c0_i32_0 = arith.constant 0 : i32
    return %c0_i32, %arg0 : i32, i32
  }
  func.func @transform_1(%arg0: i32) -> (i32, i32) {
    %c0_i32 = arith.constant 0 : i32
    %c0_i32_0 = arith.constant 0 : i32
    %c0_i32_1 = arith.constant 0 : i32
    return %c0_i32, %c0_i32_0 : i32, i32
  }
  func.func @transform_2(%arg0: i32) -> (i32, i32) {
    %c0_i32 = arith.constant 0 : i32
    %c0_i32_0 = arith.constant 0 : i32
    %c0_i32_1 = arith.constant 0 : i32
    return %c0_i32, %c0_i32_0 : i32, i32
  }
  func.func @transform_3(%arg0: i32) -> (i32, i32) {
    %c0_i32 = arith.constant 0 : i32
    %c0_i32_0 = arith.constant 0 : i32
    %c0_i32_1 = arith.constant 0 : i32
    return %c0_i32, %c0_i32_0 : i32, i32
  }
  func.func @transform_4(%arg0: i32) -> (i32, i32) {
    %c0_i32 = arith.constant 0 : i32
    %c0_i32_0 = arith.constant 0 : i32
    %c0_i32_1 = arith.constant 0 : i32
    return %c0_i32, %c0_i32_0 : i32, i32
  }
  func.func @transform_5(%arg0: i32) -> (i32, i32) {
    %c0_i32 = arith.constant 0 : i32
    %c0_i32_0 = arith.constant 0 : i32
    %c0_i32_1 = arith.constant 0 : i32
    return %c0_i32, %c0_i32_0 : i32, i32
  }
  func.func @transform_6(%arg0: i32) -> (i32, i32) {
    %c0_i32 = arith.constant 0 : i32
    %c0_i32_0 = arith.constant 0 : i32
    %c0_i32_1 = arith.constant 0 : i32
    return %c0_i32, %c0_i32_0 : i32, i32
  }
  func.func @transform_7(%arg0: i32) -> (i32, i32) {
    %c0_i32 = arith.constant 0 : i32
    %c0_i32_0 = arith.constant 0 : i32
    return %c0_i32, %arg0 : i32, i32
  }
}

</mosaic_0001>

<bundles_post_ra>
// kernel: _forward_impl.1
= control target key start
LH: loop header
LB: loop body
LE: loop exit
PB: predicated region body
PF: predicated region fallthrough
CT: control target
= control target key end

     0   :  { %vm62_vm0 = vcmask 1042432   ;;  %v324_v0 = vmov 0.0   ;;  %vm325_vm1 = vmmov 0   ;;  %v326_v3 = vmov 0   ;;  %s402_s0 = inlined_call_operand.vmem [shape: bf16[22,128], index: 0, kind: input, shape index: {}]   ;;  %s403_s2 = inlined_call_operand.vmem [shape: f32[16,1], index: 2, kind: input, shape index: {}]   ;;  %s404_s1 = inlined_call_operand.vmem [shape: bf16[16,22], index: 1, kind: input, shape index: {}]   ;;  %s405_s4 = inlined_call_operand.vmem [shape: f32[8,1], index: 4, kind: input, shape index: {}]   ;;  %s406_s6 = inlined_call_operand.vmem [shape: f32[2,1], index: 6, kind: input, shape index: {}]   ;;  %s407_s3 = inlined_call_operand.vmem [shape: f32[8,16], index: 3, kind: input, shape index: {}]   ;;  %s408_s5 = inlined_call_operand.vmem [shape: f32[2,8], index: 5, kind: input, shape index: {}]   ;;  %s409_s7 = inlined_call_operand.vmem [shape: bf16[2,128], index: 7, kind: output, shape index: {}]  }
   0x1   :  { %292 = vmatprep.subr.bf16.mxu0 %v324_v0  ;;  %v321_v1 = vld [vmem:[%s402_s0] sm:$0xff]   ;;  %296 = vmatprep.mubr.msk.bf16.mxu0 %vm325_vm1, %v324_v0  ;;  %v322_v2 = vld [vmem:[%s402_s0 + $0x8] ss:$0 sps:$4 sm:$0x77]   ;;  %vm58_vm2 = vcmask 179200   ;;  %v327_v8 = vmov 0.0|0.0  }
   0x2   :  { %319 = vset.pattern.permute.xlu0 %v326_v3  ;;  %304 = vmatprep.mubr.msk.f32.mxu1 %vm325_vm1, %v324_v0  ;;  %v32_v4 = vld [vmem:[%s403_s2] sm:$0xff]  ;;  %v64_v5 = vsel %vm62_vm0, %v322_v2, 0  ;;  %v33_v6 = vld [vmem:[%s403_s2 + $0x8] sm:$0xff]  ;;  %vm116_vm3 = vcmask 130048   ;;  %vm198_vm4 = vcmask 64512  }
   0x3   :  { %293 = vmatpush3.bf16.msra.mxu0 %v321_v1  ;;  %320 = vset.pattern.permute.xlu1 %v326_v3  ;;  %v323_v7 = vld [vmem:[%s404_s1] sm:$0xff]  }
   0x4   :  { %294 = vmatprep.subr.bf16.mxu0 %v324_v0  ;;  %36 = vperm.xlu0 %319, %v32_v4   ;;  %v110_v9 = vld [vmem:[%s405_s4] sm:$0xff] }
   0x5   :  { %312 = vmatprep.subr.bf16.mxu1 %v327_v8  ;;  %113 = vperm.xlu1 %320, %v110_v9   ;;  %v192_v10 = vld [vmem:[%s406_s6] sm:$0x3] }
   0x6   :  { %v109_v22 = vld [vmem:[%s407_s3] sm:$0xff] }
   0x7   :  { %295 = vmatpush3.bf16.msra.mxu0 %v64_v5  ;;  %v191_v28 = vld [vmem:[%s408_s5] sm:$0x3] }
   0x8   :  { %41 = vperm.xlu0 %319, %v33_v6  }
   0x9   :  { %195 = vperm.xlu1 %320, %v192_v10  }
   0xa   :  { %297 = vmatmul.mubr.msk.bf16.vlgmr.msra.gmra.mrb[0].mxu0 %vm58_vm2, %v323_v7 }
  0x83   :  { %v37_v11 = vpop.permute.xlu0 %36 }
  0x84   :  { %v114_v23 = vpop.permute.xlu1 %113 }
  0x87   :  { %v42_v15 = vpop.permute.xlu0 %41 }
  0x88   :  { %v196_v29 = vpop.permute.xlu1 %195 }
  0xdd   :  { %v100_v12 = vpop.f32.mrb[0].mxu0 }
  0xde   :  { %v101_v13 = vadd.f32 %v100_v12, %v37_v11  ;;  %v298_v14 = vpop.f32.mrb[1].mxu0 }
  0xdf   :  { %v103_v16 = vpop.f32.mrb[2].mxu0 }
  0xe0   :  { %v104_v17 = vadd.f32 %v103_v16, %v42_v15  ;;  %v299_v18 = vpop.f32.mrb[3].mxu0  ;;  %v107_v19 = vmax.f32 %v101_v13, 0.0 }
  0xe2   :  { %v108_v20 = vmax.f32 %v104_v17, 0.0 }
  0xe4   :  { %v313_v21 = vpack.c.bf16 %v108_v20, %v107_v19 }
  0xe6   :  { %314 = vmatpush3.bf16.msra.mxu1 %v313_v21 }
  0xe7   :  { %307 = vmatprep.subr.mxu1 %v324_v0 }
  0xe9   :  { %305 = vmatmul.mubr.msk.f32.vlgmr.msra.gmra.mrb[0].mxu1 %vm116_vm3, %v109_v22 }
  0xea   :  { %309 = vmatprep.mubr.msk.f32.mxu1 %vm325_vm1, %v324_v0 }
 0x1bc   :  { %v186_v24 = vpop.f32.mrb[0].mxu1 }
 0x1bd   :  { %v187_v25 = vadd.f32 %v186_v24, %v114_v23  ;;  %v306_v26 = vpop.f32.mrb[1].mxu1 }
 0x1bf   :  { %v190_v27 = vmax.f32 %v187_v25, 0.0 }
 0x1c1   :  { %308 = vmatpush3.msra.mxu1 %v190_v27 }
 0x1c2   :  { %310 = vmatmul.mubr.msk.f32.vlgmr.msra.gmra.mrb[2].mxu1 %vm198_vm4, %v191_v28 }
 0x295   :  { %v268_v30 = vpop.f32.mrb[2].mxu1 }
 0x296   :  { %v269_v31 = vadd.f32 %v268_v30, %v196_v29  ;;  %v311_v32 = vpop.f32.mrb[3].mxu1 }
 0x298   :  { %v272_v33 = vpack.c.bf16 %v269_v31, %v269_v31 }
 0x29a   :  { %273 = vst [vmem:[%s409_s7] sm:$0x1] %v272_v33 }

</bundles_post_ra>
